<compile_context>
chip_gen: v6e
topology: v6e:2x2x1
jax: 0.10.0
libtpu: 0.0.40
codegen_flags: <defaults>
</compile_context>

<pallas_src>
import functools

import jax
import jax.numpy as jnp
from jax.experimental import pallas as pl
from jax.experimental.pallas import tpu as pltpu


def _gcn_layer_kernel(layers, mem_dim, head_dim, block_b, n_nodes,
                      adj_ref, x_ref, *refs):
    """One grid step handles `block_b` batch elements, batch folded into M.

    refs = (W_0..W_{L-1}, b_0..b_{L-1}, W_out, b_out, o_ref)
    Weights are pre-transposed to (in, out).
    """
    o_ref = refs[-1]
    w_refs = refs[:layers]
    b_refs = refs[layers:2 * layers]
    wout_ref = refs[2 * layers]
    bout_ref = refs[2 * layers + 1]

    BN = block_b * n_nodes

    adj = adj_ref[...]                                    # (block_b, N, N) f32
    # Fold batch into the matmul M dimension (sublane-only reshape).
    x = x_ref[...].reshape(BN, mem_dim)                   # (block_b*N, mem_dim)

    # denom = adj.sum(-1) + 1; reciprocal on the EUP, once per grid step.
    inv_denom = pl.reciprocal(
        jnp.sum(adj, axis=2, keepdims=True) + 1.0, approx=False)  # (block_b, N, 1)

    g_list = []                                           # per-layer ReLU outputs
    for l in range(layers):
        w_ref = w_refs[l]                                 # (mem_dim + l*head_dim, head_dim)
        # P = cat(x, g_0..g_{l-1}) @ W_l without materializing the concat:
        # use the row-block split of W_l (aligned static VMEM-ref slices,
        # loaded at point of use to keep vreg pressure low).
        P = jnp.dot(x, w_ref[:mem_dim, :], preferred_element_type=jnp.float32)
        for j, g in enumerate(g_list):
            lo = mem_dim + j * head_dim
            P += jnp.dot(g, w_ref[lo:lo + head_dim, :],
                         preferred_element_type=jnp.float32)
        P3 = P.reshape(block_b, n_nodes, head_dim)
        # (adj@outputs)@W + b + outputs@W + b  ==  adj@P + P + 2b
        AxP = jnp.einsum('bij,bjh->bih', adj, P3,
                         preferred_element_type=jnp.float32)
        AxW = (AxP + P3 + 2.0 * b_refs[l][...]) * inv_denom
        g = jnp.maximum(AxW, 0.0).reshape(BN, head_dim)   # ReLU, refold batch
        # TODO(synk): nn.Dropout(opt.gcn_dropout) omitted (eval-mode identity).
        g_list.append(g)

    # out = (cat(g_0..g_{L-1}) + x) @ W_out + b_out, again via W_out row blocks.
    out = jnp.dot(x, wout_ref[...], preferred_element_type=jnp.float32) + bout_ref[...]
    for l, g in enumerate(g_list):
        lo = l * head_dim
        out += jnp.dot(g, wout_ref[lo:lo + head_dim, :],
                       preferred_element_type=jnp.float32)
    o_ref[...] = out.reshape(block_b, n_nodes, mem_dim).astype(o_ref.dtype)


def _choose_block_b(B, min_steps=4):
    """Largest batch block that still gives >= min_steps grid steps.

    min_steps=4 keeps >= 2 steps per TensorCore on v7x (2 TCs/chip) and >= 2
    steps on v5e/v6e, so BlockSpec double-buffering overlaps DMA with compute.
    """
    for cand in (16, 8, 4, 2):
        if B % cand == 0 and B // cand >= min_steps:
            return cand
    return 1


def graph_conv_layer(adj, gcn_inputs, weights, biases, w_out, b_out, *, block_b=None):
    """adj: (B,N,N), gcn_inputs: (B,N,mem_dim). Returns (B,N,mem_dim).

    weights[l]: (mem_dim + l*head_dim, head_dim)  (pre-transposed nn.Linear)
    biases[l] : (1, head_dim);  w_out: (mem_dim, mem_dim);  b_out: (1, mem_dim)
    """
    B, N, D = gcn_inputs.shape
    layers = len(weights)
    head_dim = weights[0].shape[1]
    assert layers * head_dim == D, (
        f"GraphConvLayer requires layers*head_dim == mem_dim, got "
        f"{layers}*{head_dim} != {D}")
    for l, W in enumerate(weights):
        assert W.shape == (D + l * head_dim, head_dim)

    if block_b is None:
        block_b = _choose_block_b(B)
    assert B % block_b == 0
    grid_b = B // block_b

    kernel = functools.partial(_gcn_layer_kernel, layers, D, head_dim, block_b, N)

    in_specs = [
        pl.BlockSpec((block_b, N, N), lambda b: (b, 0, 0)),
        pl.BlockSpec((block_b, N, D), lambda b: (b, 0, 0)),
    ]
    params = []
    # Weights/biases use a constant index_map, so Pallas DMAs them only once.
    # (Single-buffering them via pipeline_mode=pl.Buffered(1) would halve their
    #  VMEM footprint; negligible at these sizes, worth doing if mem_dim grows.)
    for W in weights:
        in_specs.append(pl.BlockSpec(W.shape, lambda b: (0, 0)))
        params.append(W)
    for bb in biases:
        in_specs.append(pl.BlockSpec(bb.shape, lambda b: (0, 0)))
        params.append(bb)
    in_specs.append(pl.BlockSpec(w_out.shape, lambda b: (0, 0)))
    in_specs.append(pl.BlockSpec(b_out.shape, lambda b: (0, 0)))
    params += [w_out, b_out]

    return pl.pallas_call(
        kernel,
        out_shape=jax.ShapeDtypeStruct((B, N, D), gcn_inputs.dtype),
        grid_spec=pltpu.PrefetchScalarGridSpec(
            num_scalar_prefetch=0,
            grid=(grid_b,),
            in_specs=in_specs,
            out_specs=pl.BlockSpec((block_b, N, D), lambda b: (b, 0, 0)),
        ),
        compiler_params=pltpu.CompilerParams(
            dimension_semantics=("parallel",),
            vmem_limit_bytes=32 * 1024 * 1024,
        ),
    )(adj, gcn_inputs, *params)


def _reference(adj, x, weights, biases, w_out, b_out):
    """Pure-JAX reference mirroring the PyTorch forward."""
    denom = jnp.sum(adj, axis=2, keepdims=True) + 1.0
    outputs = x
    cache_list = [outputs]
    output_list = []
    for W, b in zip(weights, biases):
        Ax = jnp.einsum("bij,bjd->bid", adj, outputs)
        AxW = Ax @ W + b
        AxW = AxW + outputs @ W + b
        AxW = AxW / denom
        gAxW = jax.nn.relu(AxW)
        cache_list.append(gAxW)
        outputs = jnp.concatenate(cache_list, axis=2)
        output_list.append(gAxW)
    gcn_outputs = jnp.concatenate(output_list, axis=2) + x
    return gcn_outputs @ w_out + b_out


if __name__ == "__main__":
    B, N = 4, 16
    mem_dim, layers = 64, 2
    head_dim = mem_dim // layers

    key = jax.random.PRNGKey(0)
    keys = jax.random.split(key, 4 + 2 * layers)

    # Inputs: binary adjacency, dense node features.
    adj = (jax.random.uniform(keys[0], (B, N, N)) > 0.7).astype(jnp.float32)
    gcn_inputs = jax.random.normal(keys[1], (B, N, mem_dim), dtype=jnp.float32)

    # Per-layer Linear(mem_dim + head_dim*i -> head_dim), stored as (in, out).
    weights, biases = [], []
    for i in range(layers):
        in_dim = mem_dim + head_dim * i
        weights.append(0.1 * jax.random.normal(
            keys[2 + 2 * i], (in_dim, head_dim), dtype=jnp.float32))
        biases.append(0.1 * jax.random.normal(
            keys[3 + 2 * i], (1, head_dim), dtype=jnp.float32))

    # linear_output: Linear(mem_dim -> mem_dim), stored as (in, out).
    w_out = 0.1 * jax.random.normal(keys[-2], (mem_dim, mem_dim), dtype=jnp.float32)
    b_out = 0.1 * jax.random.normal(keys[-1], (1, mem_dim), dtype=jnp.float32)

    out = graph_conv_layer(adj, gcn_inputs, weights, biases, w_out, b_out)
    out = jax.block_until_ready(out)

    ref = _reference(adj, gcn_inputs, weights, biases, w_out, b_out)
    assert out.shape == (B, N, mem_dim)
    assert jnp.allclose(out, ref, atol=1e-4, rtol=1e-4), "mismatch vs reference"

    print("KERNEL_OK")
</pallas_src>

<mosaic_0001>
module attributes {stable_mosaic.version = 11 : i64} {
  func.func @_gcn_layer_kernel(%arg0: i32, %arg1: memref<1x16x16xf32, #tpu.memory_space<vmem>>, %arg2: memref<1x16x64xf32, #tpu.memory_space<vmem>>, %arg3: memref<64x32xf32, #tpu.memory_space<vmem>>, %arg4: memref<96x32xf32, #tpu.memory_space<vmem>>, %arg5: memref<1x32xf32, #tpu.memory_space<vmem>>, %arg6: memref<1x32xf32, #tpu.memory_space<vmem>>, %arg7: memref<64x64xf32, #tpu.memory_space<vmem>>, %arg8: memref<1x64xf32, #tpu.memory_space<vmem>>, %arg9: memref<1x16x64xf32, #tpu.memory_space<vmem>>) attributes {dimension_semantics = [#tpu.dimension_semantics<parallel>], iteration_bounds = array<i64: 4>, scalar_prefetch = 0 : i64, scratch_operands = 0 : i64, tpu.core_type = #tpu.core_type<tc>, window_params = [{transform_indices = @transform_0, window_bounds = array<i64: 1, 16, 16>}, {transform_indices = @transform_1, window_bounds = array<i64: 1, 16, 64>}, {pipeline_mode = #tpu.pipeline_mode<synchronous>, transform_indices = @transform_2, window_bounds = array<i64: 64, 32>}, {pipeline_mode = #tpu.pipeline_mode<synchronous>, transform_indices = @transform_3, window_bounds = array<i64: 96, 32>}, {pipeline_mode = #tpu.pipeline_mode<synchronous>, transform_indices = @transform_4, window_bounds = array<i64: 1, 32>}, {pipeline_mode = #tpu.pipeline_mode<synchronous>, transform_indices = @transform_5, window_bounds = array<i64: 1, 32>}, {pipeline_mode = #tpu.pipeline_mode<synchronous>, transform_indices = @transform_6, window_bounds = array<i64: 64, 64>}, {pipeline_mode = #tpu.pipeline_mode<synchronous>, transform_indices = @transform_7, window_bounds = array<i64: 1, 64>}, {transform_indices = @transform_8, window_bounds = array<i64: 1, 16, 64>}]} {
    %c0 = arith.constant 0 : index
    %c0_0 = arith.constant 0 : index
    %c0_1 = arith.constant 0 : index
    %0 = vector.load %arg1[%c0, %c0_0, %c0_1] : memref<1x16x16xf32, #tpu.memory_space<vmem>>, vector<1x16x16xf32>
    %c0_2 = arith.constant 0 : index
    %c0_3 = arith.constant 0 : index
    %c0_4 = arith.constant 0 : index
    %1 = vector.load %arg2[%c0_2, %c0_3, %c0_4] : memref<1x16x64xf32, #tpu.memory_space<vmem>>, vector<1x16x64xf32>
    %2 = vector.shape_cast %1 : vector<1x16x64xf32> to vector<16x64xf32>
    %cst = arith.constant dense<0.000000e+00> : vector<1x16xf32>
    %3 = vector.multi_reduction <add>, %0, %cst [2] : vector<1x16x16xf32> to vector<1x16xf32>
    %4 = vector.shape_cast %3 : vector<1x16xf32> to vector<1x16x1xf32>
    %cst_5 = arith.constant 1.000000e+00 : f32
    %5 = vector.broadcast %cst_5 : f32 to vector<1x16x1xf32>
    %6 = arith.addf %4, %5 : vector<1x16x1xf32>
    %7 = tpu.reciprocal %6 : vector<1x16x1xf32> -> vector<1x16x1xf32>
    %c0_6 = arith.constant 0 : index
    %c0_7 = arith.constant 0 : index
    %8 = vector.load %arg3[%c0_6, %c0_7] : memref<64x32xf32, #tpu.memory_space<vmem>>, vector<64x32xf32>
    %cst_8 = arith.constant dense<0.000000e+00> : vector<16x32xf32>
    %9 = tpu.matmul %2, %8, %cst_8 {dimension_numbers = #tpu.dot_dimension_numbers<[1], [0], [0], [1], [0, 0, 1, 1], [], []>} : vector<16x64xf32>, vector<64x32xf32>, vector<16x32xf32> -> vector<16x32xf32>
    %10 = vector.shape_cast %9 : vector<16x32xf32> to vector<1x16x32xf32>
    "tpu.trace_start"() <{level = 10 : i32, message = "bij,bjh->bih"}> : () -> ()
    %cst_9 = arith.constant dense<0.000000e+00> : vector<1x16x32xf32>
    %11 = tpu.matmul %0, %10, %cst_9 {dimension_numbers = #tpu.dot_dimension_numbers<[2], [1], [1], [2], [0, 0, 0, 1, 1, 2], [0], [0]>} : vector<1x16x16xf32>, vector<1x16x32xf32>, vector<1x16x32xf32> -> vector<1x16x32xf32>
    "tpu.trace_stop"() : () -> ()
    %12 = arith.addf %11, %10 : vector<1x16x32xf32>
    %c0_10 = arith.constant 0 : index
    %c0_11 = arith.constant 0 : index
    %13 = vector.load %arg5[%c0_10, %c0_11] : memref<1x32xf32, #tpu.memory_space<vmem>>, vector<1x32xf32>
    %cst_12 = arith.constant 2.000000e+00 : f32
    %14 = vector.broadcast %cst_12 : f32 to vector<1x32xf32>
    %15 = arith.mulf %14, %13 : vector<1x32xf32>
    %16 = vector.shape_cast %15 : vector<1x32xf32> to vector<1x1x32xf32>
    %17 = vector.broadcast %16 : vector<1x1x32xf32> to vector<1x16x32xf32>
    %18 = arith.addf %12, %17 : vector<1x16x32xf32>
    %19 = vector.broadcast %7 : vector<1x16x1xf32> to vector<1x16x32xf32>
    %20 = arith.mulf %18, %19 : vector<1x16x32xf32>
    %cst_13 = arith.constant 0.000000e+00 : f32
    %21 = vector.broadcast %cst_13 : f32 to vector<1x16x32xf32>
    %22 = arith.maximumf %20, %21 : vector<1x16x32xf32>
    %23 = vector.shape_cast %22 : vector<1x16x32xf32> to vector<16x32xf32>
    %c0_14 = arith.constant 0 : index
    %c0_15 = arith.constant 0 : index
    %24 = vector.load %arg4[%c0_14, %c0_15] : memref<96x32xf32, #tpu.memory_space<vmem>>, vector<64x32xf32>
    %cst_16 = arith.constant dense<0.000000e+00> : vector<16x32xf32>
    %25 = tpu.matmul %2, %24, %cst_16 {dimension_numbers = #tpu.dot_dimension_numbers<[1], [0], [0], [1], [0, 0, 1, 1], [], []>} : vector<16x64xf32>, vector<64x32xf32>, vector<16x32xf32> -> vector<16x32xf32>
    %c64 = arith.constant 64 : index
    %c0_17 = arith.constant 0 : index
    %26 = vector.load %arg4[%c64, %c0_17] : memref<96x32xf32, #tpu.memory_space<vmem>>, vector<32x32xf32>
    %cst_18 = arith.constant dense<0.000000e+00> : vector<16x32xf32>
    %27 = tpu.matmul %23, %26, %cst_18 {dimension_numbers = #tpu.dot_dimension_numbers<[1], [0], [0], [1], [0, 0, 1, 1], [], []>} : vector<16x32xf32>, vector<32x32xf32>, vector<16x32xf32> -> vector<16x32xf32>
    %28 = arith.addf %25, %27 : vector<16x32xf32>
    %29 = vector.shape_cast %28 : vector<16x32xf32> to vector<1x16x32xf32>
    "tpu.trace_start"() <{level = 10 : i32, message = "bij,bjh->bih"}> : () -> ()
    %cst_19 = arith.constant dense<0.000000e+00> : vector<1x16x32xf32>
    %30 = tpu.matmul %0, %29, %cst_19 {dimension_numbers = #tpu.dot_dimension_numbers<[2], [1], [1], [2], [0, 0, 0, 1, 1, 2], [0], [0]>} : vector<1x16x16xf32>, vector<1x16x32xf32>, vector<1x16x32xf32> -> vector<1x16x32xf32>
    "tpu.trace_stop"() : () -> ()
    %31 = arith.addf %30, %29 : vector<1x16x32xf32>
    %c0_20 = arith.constant 0 : index
    %c0_21 = arith.constant 0 : index
    %32 = vector.load %arg6[%c0_20, %c0_21] : memref<1x32xf32, #tpu.memory_space<vmem>>, vector<1x32xf32>
    %cst_22 = arith.constant 2.000000e+00 : f32
    %33 = vector.broadcast %cst_22 : f32 to vector<1x32xf32>
    %34 = arith.mulf %33, %32 : vector<1x32xf32>
    %35 = vector.shape_cast %34 : vector<1x32xf32> to vector<1x1x32xf32>
    %36 = vector.broadcast %35 : vector<1x1x32xf32> to vector<1x16x32xf32>
    %37 = arith.addf %31, %36 : vector<1x16x32xf32>
    %38 = vector.broadcast %7 : vector<1x16x1xf32> to vector<1x16x32xf32>
    %39 = arith.mulf %37, %38 : vector<1x16x32xf32>
    %cst_23 = arith.constant 0.000000e+00 : f32
    %40 = vector.broadcast %cst_23 : f32 to vector<1x16x32xf32>
    %41 = arith.maximumf %39, %40 : vector<1x16x32xf32>
    %42 = vector.shape_cast %41 : vector<1x16x32xf32> to vector<16x32xf32>
    %c0_24 = arith.constant 0 : index
    %c0_25 = arith.constant 0 : index
    %43 = vector.load %arg7[%c0_24, %c0_25] : memref<64x64xf32, #tpu.memory_space<vmem>>, vector<64x64xf32>
    %cst_26 = arith.constant dense<0.000000e+00> : vector<16x64xf32>
    %44 = tpu.matmul %2, %43, %cst_26 {dimension_numbers = #tpu.dot_dimension_numbers<[1], [0], [0], [1], [0, 0, 1, 1], [], []>} : vector<16x64xf32>, vector<64x64xf32>, vector<16x64xf32> -> vector<16x64xf32>
    %c0_27 = arith.constant 0 : index
    %c0_28 = arith.constant 0 : index
    %45 = vector.load %arg8[%c0_27, %c0_28] : memref<1x64xf32, #tpu.memory_space<vmem>>, vector<1x64xf32>
    %46 = vector.broadcast %45 : vector<1x64xf32> to vector<16x64xf32>
    %47 = arith.addf %44, %46 : vector<16x64xf32>
    %c0_29 = arith.constant 0 : index
    %c0_30 = arith.constant 0 : index
    %48 = vector.load %arg7[%c0_29, %c0_30] : memref<64x64xf32, #tpu.memory_space<vmem>>, vector<32x64xf32>
    %cst_31 = arith.constant dense<0.000000e+00> : vector<16x64xf32>
    %49 = tpu.matmul %23, %48, %cst_31 {dimension_numbers = #tpu.dot_dimension_numbers<[1], [0], [0], [1], [0, 0, 1, 1], [], []>} : vector<16x32xf32>, vector<32x64xf32>, vector<16x64xf32> -> vector<16x64xf32>
    %50 = arith.addf %47, %49 : vector<16x64xf32>
    %c32 = arith.constant 32 : index
    %c0_32 = arith.constant 0 : index
    %51 = vector.load %arg7[%c32, %c0_32] : memref<64x64xf32, #tpu.memory_space<vmem>>, vector<32x64xf32>
    %cst_33 = arith.constant dense<0.000000e+00> : vector<16x64xf32>
    %52 = tpu.matmul %42, %51, %cst_33 {dimension_numbers = #tpu.dot_dimension_numbers<[1], [0], [0], [1], [0, 0, 1, 1], [], []>} : vector<16x32xf32>, vector<32x64xf32>, vector<16x64xf32> -> vector<16x64xf32>
    %53 = arith.addf %50, %52 : vector<16x64xf32>
    %54 = vector.shape_cast %53 : vector<16x64xf32> to vector<1x16x64xf32>
    %c0_34 = arith.constant 0 : index
    %c0_35 = arith.constant 0 : index
    %c0_36 = arith.constant 0 : index
    %55 = vector.load %arg9[%c0_34, %c0_35, %c0_36] : memref<1x16x64xf32, #tpu.memory_space<vmem>>, vector<1x16x64xf32>
    tpu.vector_store %arg9[%c0_34, %c0_35, %c0_36], %54 {strides = array<i32>} : memref<1x16x64xf32, #tpu.memory_space<vmem>>, vector<1x16x64xf32>,
    return
  }
  func.func @transform_0(%arg0: i32) -> (i32, i32, i32) {
    %c0_i32 = arith.constant 0 : i32
    %c0_i32_0 = arith.constant 0 : i32
    %c0_i32_1 = arith.constant 0 : i32
    return %arg0, %c0_i32, %c0_i32_0 : i32, i32, i32
  }
  func.func @transform_1(%arg0: i32) -> (i32, i32, i32) {
    %c0_i32 = arith.constant 0 : i32
    %c0_i32_0 = arith.constant 0 : i32
    %c0_i32_1 = arith.constant 0 : i32
    return %arg0, %c0_i32, %c0_i32_0 : i32, i32, i32
  }
  func.func @transform_2(%arg0: i32) -> (i32, i32) {
    %c0_i32 = arith.constant 0 : i32
    %c0_i32_0 = arith.constant 0 : i32
    %c0_i32_1 = arith.constant 0 : i32
    return %c0_i32, %c0_i32_0 : i32, i32
  }
  func.func @transform_3(%arg0: i32) -> (i32, i32) {
    %c0_i32 = arith.constant 0 : i32
    %c0_i32_0 = arith.constant 0 : i32
    %c0_i32_1 = arith.constant 0 : i32
    return %c0_i32, %c0_i32_0 : i32, i32
  }
  func.func @transform_4(%arg0: i32) -> (i32, i32) {
    %c0_i32 = arith.constant 0 : i32
    %c0_i32_0 = arith.constant 0 : i32
    %c0_i32_1 = arith.constant 0 : i32
    return %c0_i32, %c0_i32_0 : i32, i32
  }
  func.func @transform_5(%arg0: i32) -> (i32, i32) {
    %c0_i32 = arith.constant 0 : i32
    %c0_i32_0 = arith.constant 0 : i32
    %c0_i32_1 = arith.constant 0 : i32
    return %c0_i32, %c0_i32_0 : i32, i32
  }
  func.func @transform_6(%arg0: i32) -> (i32, i32) {
    %c0_i32 = arith.constant 0 : i32
    %c0_i32_0 = arith.constant 0 : i32
    %c0_i32_1 = arith.constant 0 : i32
    return %c0_i32, %c0_i32_0 : i32, i32
  }
  func.func @transform_7(%arg0: i32) -> (i32, i32) {
    %c0_i32 = arith.constant 0 : i32
    %c0_i32_0 = arith.constant 0 : i32
    %c0_i32_1 = arith.constant 0 : i32
    return %c0_i32, %c0_i32_0 : i32, i32
  }
  func.func @transform_8(%arg0: i32) -> (i32, i32, i32) {
    %c0_i32 = arith.constant 0 : i32
    %c0_i32_0 = arith.constant 0 : i32
    %c0_i32_1 = arith.constant 0 : i32
    return %arg0, %c0_i32, %c0_i32_0 : i32, i32, i32
  }
}

</mosaic_0001>

<bundles_post_ra>
// kernel: tpu_custom_call.1
= control target key start
LH: loop header
LB: loop body
LE: loop exit
PB: predicated region body
PF: predicated region fallthrough
CT: control target
= control target key end

     0   :  { %13 = vsyncpa [#allocation3], 0  ;;  %s1745_s0 = inlined_call_operand.vmem [shape: f32[4,16,16], index: 0, kind: input, shape index: {}]   ;;  %s1746_s1 = inlined_call_operand.vmem [shape: f32[4,16,64], index: 1, kind: input, shape index: {}]   ;;  %s1747_s2 = inlined_call_operand.vmem [shape: f32[64,32], index: 2, kind: input, shape index: {}]   ;;  %s1748_s3 = inlined_call_operand.vmem [shape: f32[96,32], index: 3, kind: input, shape index: {}]   ;;  %s1749_s4 = inlined_call_operand.vmem [shape: f32[1,32], index: 4, kind: input, shape index: {}]   ;;  %s1750_s5 = inlined_call_operand.vmem [shape: f32[1,32], index: 5, kind: input, shape index: {}]   ;;  %s1751_s6 = inlined_call_operand.vmem [shape: f32[64,64], index: 6, kind: input, shape index: {}]   ;;  %s1752_s7 = inlined_call_operand.vmem [shape: f32[1,64], index: 7, kind: input, shape index: {}]   ;;  %s1753_s8 = inlined_call_operand.hbm [shape: f32[4,16,64], index: 8, kind: output, shape index: {}]  }
   0x1   :  { %15 = vsyncpa [#allocation3 + $0x1], 0  ;;  %s1475_s27 = smov 0   ;;  %s1477_s28 = smov 0  }
   0x2   :  { %s1479_s29 = smov 0   ;;  %s1481_s30 = smov 0  }
   0x3 LB: > { %s1496_s9 = sadd.s32 4294967295, %s1425_s30   ;;  %s1126_s10 = sadd.s32 4294967294, %s1425_s30   ;;  %s1425_s30 = sphi %s1481_s30, %s1759_s30   ;;  %s1421_s29 = sphi %s1479_s29, %s1758_s29   ;;  %s1417_s28 = sphi %s1477_s28, %s1757_s28   ;;  %s1413_s27 = sphi %s1475_s27, %s1756_s27  }
   0x4   : > { %s1500_s11 = sadd.s32 1, %s1425_s30   ;;  %s206_s12 = sadd.s32 1, %s1421_s29 }
   0x5   : > { %s203_s13 = ssub.s32 %s1425_s30, %s1500_s11  ;;  %p216_p0 = scmp.ne.s32.totalorder %s1421_s29, %s1417_s28 }
   0x6   : > { %p204_p1 = scmp.eq.s32.totalorder %s203_s13, 0  ;;  %p217_p2 = scmp.eq.s32.totalorder %s1496_s9, 3 }
   0x7   : > { %p222_p3 = scmp.ne.s32.totalorder %s1417_s28, %s1413_s27  ;;  %p223_p4 = scmp.eq.s32.totalorder %s1126_s10, 3 }
   0x8   : > { %s1511_s14 = scalar_select %p204_p1, %s1421_s29, %s206_s12  }
   0x9   : > { %p1513_p5 = por %p217_p2, %p216_p0  ;;  %p1517_p6 = por %p223_p4, %p222_p3 }
   0xa   : > { %p1129_p7 = scmp.ge.s32.totalorder %s1425_s30, 1  ;;  %p275_p8 = scmp.lt.s32.totalorder %s1425_s30, 5 }
   0xc   : > { %p276_p9 = pnand %p1129_p7, %p275_p8 }
   0xd   : > { %p314_p10 = scmp.lt.s32.totalorder (!%p276_p9), %s1496_s9, 3  ;;  %s311_s20 = sand.u32 (!%p276_p9), 1, %s1417_s28  }
   0xe   : > { %279 = sbr.rel (%p276_p9) target bundleno = 1067 (0x42b), region = 52  ;;  %s1159_s10 = sshll.u32 (!%p276_p9), %s1496_s9, 8 }
   0xf   : > { %s1427_s18 = smov (!%p276_p9), [#allocation2]  }
  0x10   : > { %s1369_s19 = sshll.u32 (!%p276_p9), %s1427_s18, 4  ;;  %s1370_s19 = int_to_ptr.vmem [resolvable:$false] %s1369_s19 }
  0x11   : > { %s1371_s21 = scalar_lea.vmem (!%p276_p9), %s1370_s19, 512 }
  0x13   : > { %v346_v0 = vld [vmem:[%s1747_s2 + $0x38] sm:$0xff]  ;;  %v345_v1 = vld [vmem:[%s1747_s2 + $0x30] sm:$0xff]  ;;  %v344_v2 = vld [vmem:[%s1747_s2 + $0x28] sm:$0xff]  ;;  %s1534_s23 = scalar_select %p314_p10, %s1496_s9, 3  ;;  %vm347_vm0 = vcmask 523264   ;;  %vm328_vm1 = vcmask 130048   ;;  %v513_v24 = vlaneseq }
  0x14   : > { %1216 = vmatprep.subr.mxu0 %v346_v0  ;;  %v343_v3 = vld [vmem:[%s1747_s2 + $0x20] sm:$0xff]  ;;  %v342_v4 = vld [vmem:[%s1747_s2 + $0x18] sm:$0xff]  ;;  %v341_v6 = vld [vmem:[%s1747_s2 + $0x10] sm:$0xff]  ;;  %vm536_vm2 = vcmask 261120   ;;  %s1705_s9 = scalar_lea.sflag [#allocation3], %s311_s20 }
  0x15   : > { %1217 = vmatpush3.msra.mxu0 %v346_v0  ;;  %s1157_s26 = sshll.u32 %s1534_s23, 4  ;;  %v340_v7 = vld [vmem:[%s1747_s2 + $0x8] sm:$0xff]  ;;  %v339_v8 = vld [vmem:[%s1747_s2] sm:$0xff]  ;;  %v535_v16 = vld [vmem:[%s1748_s3 + $0x58] sm:$0xff]  ;;  %v1595_v26 = vshrl.u32 %v513_v24, 7  ;;  %s1130_s23 = sshll.u32 %s311_s20, 4 }
  0x16   : > { %1218 = vmatprep.subr.mxu0 %v345_v1  ;;  %s323_s13 = scalar_lea.vmem %s1746_s1, %s1157_s26  ;;  %s318_s12 = scalar_lea.vmem %s1745_s0, %s1157_s26  ;;  %v534_v17 = vld [vmem:[%s1748_s3 + $0x50] sm:$0xff]  ;;  %v533_v18 = vld [vmem:[%s1748_s3 + $0x48] sm:$0xff]  ;;  %v532_v19 = vld [vmem:[%s1748_s3 + $0x40] sm:$0xff] }
  0x17   : > { %1219 = vmatpush3.msra.mxu0 %v345_v1  ;;  %v1546_v5 = vld [vmem:[%s323_s13] sm:$0xff]  ;;  %v1559_v9 = vld [vmem:[%s323_s13 + $0x8] sm:$0xff]  ;;  %v531_v20 = vld [vmem:[%s1748_s3 + $0x38] sm:$0xff]  ;;  %v515_v29 = vsub.s32 0, %v1595_v26  ;;  %s313_s24 = scalar_lea.vmem [#allocation2], %s1130_s23  ;;  %s1701_s13 = scalar_lea.hbm %s1753_s8, %s1159_s10 }
  0x18   : > { %1220 = vmatprep.subr.mxu0 %v344_v2  ;;  %1232 = vmatprep.mubr.msk.f32.mxu0 %vm347_vm0, %v1546_v5  ;;  %v1568_v10 = vld [vmem:[%s318_s12] sm:$0xff]  ;;  %v1574_v12 = vld [vmem:[%s318_s12 + $0x8] sm:$0xff]  ;;  %v530_v43 = vld [vmem:[%s1748_s3 + $0x30] sm:$0xff]  ;;  %s1052_s25 = sshll.u32 %s313_s24, 4  ;;  %s1696_s25 = int_to_ptr.vmem [resolvable:$true] %s1052_s25 }
  0x19   : > { %1221 = vmatpush3.msra.mxu0 %v344_v2  ;;  %1239 = vmatprep.mubr.msk.f32.mxu1 %vm328_vm1, %v1568_v10  ;;  %v329_v11 = vsel %vm328_vm1, %v1568_v10, 0.0  ;;  %v332_v13 = vsel %vm328_vm1, %v1574_v12, 0.0  ;;  %v510_v27 = vld [vmem:[%s1749_s4] sm:$0x1]  ;;  %v529_v44 = vld [vmem:[%s1748_s3 + $0x28] sm:$0xff]  ;;  %v527_v46 = vld [vmem:[%s1748_s3 + $0x18] sm:$0xff]  ;;  %p1372_p0 = scmp.lt.s32.totalorder %s1696_s25, %s1370_s19 }
  0x1a   : > { %1222 = vmatprep.subr.mxu0 %v343_v3  ;;  %330 = vadd.xlane.f32.xlu0 %v329_v11  ;;  %v511_v28 = vmul.f32 2.0, %v510_v27  ;;  %v528_v45 = vld [vmem:[%s1748_s3 + $0x20] sm:$0xff]  ;;  %v526_v47 = vld [vmem:[%s1748_s3 + $0x10] sm:$0xff]  ;;  %v525_v48 = vld [vmem:[%s1748_s3 + $0x8] sm:$0xff]  ;;  %s1365_s17 = scalar_lea.vmem %s1696_s25, 256 }
  0x1b   : > { %1223 = vmatpush3.msra.mxu0 %v343_v3  ;;  %v524_v49 = vld [vmem:[%s1748_s3] sm:$0xff]  ;;  %v789_v50 = vld [vmem:[%s1751_s6 + $0x38] sm:$0xff]  ;;  %v788_v51 = vld [vmem:[%s1751_s6 + $0x30] sm:$0xff]  ;;  %p1366_p11 = scmp.ne.s32.totalorder %s1696_s25, %s1365_s17  ;;  %p1373_p1 = scmp.lt.s32.totalorder %s1371_s21, %s1365_s17 }
  0x1c   : > { %1224 = vmatprep.subr.mxu0 %v342_v4  ;;  %v516_v30 = vrot.slane %v511_v28, %v515_v29  ;;  %v787_v52 = vld [vmem:[%s1751_s6 + $0x28] sm:$0xff]  ;;  %v786_v53 = vld [vmem:[%s1751_s6 + $0x20] sm:$0xff]  ;;  %v785_v54 = vld [vmem:[%s1751_s6 + $0x18] sm:$0xff] }
  0x1d   : > { %1225 = vmatpush3.msra.mxu0 %v342_v4  ;;  %v784_v55 = vld [vmem:[%s1751_s6 + $0x10] sm:$0xff]  ;;  %v783_v56 = vld [vmem:[%s1751_s6 + $0x8] sm:$0xff]  ;;  %v782_v57 = vld [vmem:[%s1751_s6] sm:$0xff]  ;;  %p1367_p12 = pnand %p1366_p11, %p1513_p5  ;;  %p1374_p2 = por %p1373_p1, %p1372_p0 }
  0x1e   : > { %1226 = vmatprep.subr.mxu0 %v341_v6  ;;  %333 = vadd.xlane.f32.xlu0 %v332_v13  ;;  %v768_v0 = vld [vmem:[%s1750_s5] sm:$0x1] }
  0x1f   : > { %1227 = vmatpush3.msra.mxu0 %v341_v6  ;;  %v769_v1 = vmul.f32 2.0, %v768_v0  ;;  %p1368_p13 = pneg %p1367_p12 }
  0x20   : > { %1228 = vmatprep.subr.mxu0 %v340_v7 }
  0x21   : > { %1229 = vmatpush3.msra.mxu0 %v340_v7  ;;  %v774_v2 = vrot.slane %v769_v1, %v515_v29  ;;  %p1375_p3 = pnand %p1374_p2, %p1368_p13 }
  0x22   : > { %1230 = vmatprep.subr.mxu0 %v339_v8 }
  0x23   : > { %1231 = vmatpush3.msra.mxu0 %v339_v8 }
  0x24   : > { %1233 = vmatmul.mubr.msk.f32.vlgmr.msra.gmra.mxu0 %vm347_vm0, %v1559_v9  ;;  %1279 = vmatprep.subr.mxu0 %v789_v50 }
  0x25   : > { %1295 = vmatprep.mubr.msk.f32.mxu0 %vm347_vm0, %v1546_v5  ;;  %1280 = vmatpush3.msra.mxu0 %v789_v50 }
  0x26   : > { %1281 = vmatprep.subr.mxu0 %v788_v51 }
  0x27   : > { %1282 = vmatpush3.msra.mxu0 %v788_v51 }
  0x28   : > { %1283 = vmatprep.subr.mxu0 %v787_v52 }
  0x29   : > { %1284 = vmatpush3.msra.mxu0 %v787_v52 }
  0x2a   : > { %1285 = vmatprep.subr.mxu0 %v786_v53 }
  0x2b   : > { %1286 = vmatpush3.msra.mxu0 %v786_v53 }
  0x2c   : > { %1287 = vmatprep.subr.mxu0 %v785_v54 }
  0x2d   : > { %1288 = vmatpush3.msra.mxu0 %v785_v54 }
  0x2e   : > { %1289 = vmatprep.subr.mxu0 %v784_v55 }
  0x2f   : > { %1290 = vmatpush3.msra.mxu0 %v784_v55 }
  0x30   : > { %1291 = vmatprep.subr.mxu0 %v783_v56 }
  0x31   : > { %1292 = vmatpush3.msra.mxu0 %v783_v56 }
  0x32   : > { %1293 = vmatprep.subr.mxu0 %v782_v57 }
  0x33   : > { %1294 = vmatpush3.msra.mxu0 %v782_v57 }
  0x34   : > { %1296 = vmatmul.mubr.msk.f32.vlgmr.msra.gmra.mxu0 %vm347_vm0, %v1559_v9  ;;  %1309 = vmatprep.subr.mxu0 %v789_v50 }
  0x35   : > { %1310 = vmatpush3.msra.mxu0 %v789_v50 }
  0x36   : > { %1311 = vmatprep.subr.mxu0 %v788_v51 }
  0x37   : > { %1312 = vmatpush3.msra.mxu0 %v788_v51 }
  0x38   : > { %1313 = vmatprep.subr.mxu0 %v787_v52 }
  0x39   : > { %1314 = vmatpush3.msra.mxu0 %v787_v52 }
  0x3a   : > { %1315 = vmatprep.subr.mxu0 %v786_v53 }
  0x3b   : > { %1316 = vmatpush3.msra.mxu0 %v786_v53 }
  0xa3   : > { %v331_v21 = vpop.xlane.xlu0 %330 }
  0xa4   : > { %v335_v25 = vadd.f32 1.0, %v331_v21 }
  0xa7   : > { %v334_v22 = vpop.xlane.xlu0 %333 }
  0xa8   : > { %v336_v23 = vadd.f32 1.0, %v334_v22 }
  0xaa   : > { %1361 = vrcp.f32 %v336_v23 }
  0xab   : > { %1363 = vrcp.f32 %v335_v25 }
  0xb7   : > { %v1603_v34 = vpop.eup %1361 }
  0xb8   : > { %v1605_v38 = vpop.eup %1363 }
  0xe4   : > { %v1234_v14 = vpop.f32.mrf.mxu0 }
  0xe5   : > { %1235 = vmatprep.subr.mxu1 %v1234_v14 }
  0xe6   : > { %v420_v15 = vpop.f32.mrf.mxu0  ;;  %1236 = vmatpush3.msra.mxu1 %v1234_v14 }
  0xe7   : > { %1237 = vmatprep.subr.mxu1 %v420_v15 }
  0xe8   : > { %1238 = vmatpush3.msra.mxu1 %v420_v15 }
  0xe9   : > { %1240 = vmatmul.mubr.msk.f32.vlgmr.msra.gmra.mxu1 %vm328_vm1, %v1574_v12  ;;  %1242 = vmatprep.subr.mxu1 %v535_v16 }
  0xea   : > { %1243 = vmatpush3.msra.mxu1 %v535_v16 }
  0xeb   : > { %1244 = vmatprep.subr.mxu1 %v534_v17 }
  0xec   : > { %1245 = vmatpush3.msra.mxu1 %v534_v17 }
  0xed   : > { %1246 = vmatprep.subr.mxu1 %v533_v18 }
  0xee   : > { %1247 = vmatpush3.msra.mxu1 %v533_v18 }
  0xef   : > { %1248 = vmatprep.subr.mxu1 %v532_v19 }
  0xf0   : > { %1249 = vmatpush3.msra.mxu1 %v532_v19 }
  0xf1   : > { %1253 = vmatprep.subr.mxu1 %v531_v20 }
  0xf4   : > { %v1297_v13 = vpop.f32.mrf.mxu0 }
 0x1a9   : > { %v1241_v31 = vpop.f32.mrf.mxu1 }
 0x1aa   : > { %v507_v32 = vadd.f32 %v1241_v31, %v1234_v14  ;;  %v1145_v14 = vld [vmem:[%s1752_s7] ss:$0 sm:$0xff] }
 0x1ab   : > { %v501_v33 = vpop.f32.mrf.mxu1  ;;  %v869_v17 = vadd.f32 %v1297_v13, %v1145_v14 }
 0x1ac   : > { %v519_v35 = vadd.f32 %v516_v30, %v507_v32  ;;  %v502_v36 = vadd.f32 %v501_v33, %v420_v15  ;;  %v863_v15 = vpop.f32.mrf.mxu0 }
 0x1ad   : > { %v864_v18 = vadd.f32 %v1145_v14, %v863_v15 }
 0x1ae   : > { %v518_v37 = vadd.f32 %v516_v30, %v502_v36  ;;  %v1608_v39 = vmul.f32 %v1603_v34, %v519_v35 }
 0x1b0   : > { %v1611_v40 = vmul.f32 %v1605_v38, %v518_v37  ;;  %v523_v42 = vmax.f32 %v1608_v39, 0.0 }
 0x1b2   : > { %v522_v41 = vmax.f32 %v1611_v40, 0.0 }
 0x1b4   : > { %1250 = vmatprep.mubr.msk.f32.mxu1 %vm536_vm2, %v522_v41 }
 0x1b5   : > { %1251 = vmatmul.mubr.msk.f32.vlgmr.msra.gmra.mxu1 %vm536_vm2, %v523_v42 }
 0x1b6   : > { %1254 = vmatpush3.msra.mxu1 %v531_v20  ;;  %1269 = vmatprep.mubr.msk.f32.mxu1 %vm347_vm0, %v1546_v5 }
 0x1b7   : > { %1255 = vmatprep.subr.mxu1 %v530_v43 }
 0x1b8   : > { %1256 = vmatpush3.msra.mxu1 %v530_v43 }
 0x1b9   : > { %1257 = vmatprep.subr.mxu1 %v529_v44 }
 0x1ba   : > { %1258 = vmatpush3.msra.mxu1 %v529_v44 }
 0x1bb   : > { %1259 = vmatprep.subr.mxu1 %v528_v45 }
 0x1bc   : > { %1260 = vmatpush3.msra.mxu1 %v528_v45 }
 0x1bd   : > { %1261 = vmatprep.subr.mxu1 %v527_v46 }
 0x1be   : > { %1262 = vmatpush3.msra.mxu1 %v527_v46 }
 0x1bf   : > { %1263 = vmatprep.subr.mxu1 %v526_v47 }
 0x1c0   : > { %1264 = vmatpush3.msra.mxu1 %v526_v47 }
 0x1c1   : > { %1265 = vmatprep.subr.mxu1 %v525_v48 }
 0x1c2   : > { %1266 = vmatpush3.msra.mxu1 %v525_v48 }
 0x1c3   : > { %1267 = vmatprep.subr.mxu1 %v524_v49 }
 0x1c4   : > { %1268 = vmatpush3.msra.mxu1 %v524_v49 }
 0x1c5   : > { %1270 = vmatmul.mubr.msk.f32.vlgmr.msra.gmra.mxu1 %vm347_vm0, %v1559_v9 }
 0x1c6   : > { %1276 = vmatprep.mubr.msk.f32.mxu1 %vm328_vm1, %v1568_v10 }
 0x275   : > { %v1252_v58 = vpop.f32.mrf.mxu1 }
 0x277   : > { %v609_v59 = vpop.f32.mrf.mxu1 }
 0x285   : > { %v1271_v60 = vpop.f32.mrf.mxu1 }
 0x286   : > { %v690_v61 = vadd.f32 %v1271_v60, %v1252_v58 }
 0x287   : > { %v684_v62 = vpop.f32.mrf.mxu1 }
 0x288   : > { %v685_v63 = vadd.f32 %v684_v62, %v609_v59  ;;  %1272 = vmatprep.subr.mxu1 %v690_v61 }
 0x289   : > { %1273 = vmatpush3.msra.mxu1 %v690_v61 }
 0x28a   : > { %1274 = vmatprep.subr.mxu1 %v685_v63 }
 0x28b   : > { %1275 = vmatpush3.msra.mxu1 %v685_v63 }
 0x28c   : > { %1277 = vmatmul.mubr.msk.f32.vlgmr.msra.gmra.mxu1 %vm328_vm1, %v1574_v12  ;;  %1298 = vmatprep.subr.mxu1 %v785_v54 }
 0x28d   : > { %1299 = vmatpush3.msra.mxu1 %v785_v54  ;;  %1306 = vmatprep.mubr.msk.f32.mxu1 %vm536_vm2, %v522_v41 }
 0x28e   : > { %1300 = vmatprep.subr.mxu1 %v784_v55 }
 0x28f   : > { %1301 = vmatpush3.msra.mxu1 %v784_v55 }
 0x290   : > { %1302 = vmatprep.subr.mxu1 %v783_v56 }
 0x291   : > { %1303 = vmatpush3.msra.mxu1 %v783_v56 }
 0x292   : > { %1304 = vmatprep.subr.mxu1 %v782_v57 }
 0x293   : > { %1305 = vmatpush3.msra.mxu1 %v782_v57 }
 0x294   : > { %1307 = vmatmul.mubr.msk.f32.vlgmr.msra.gmra.mxu1 %vm536_vm2, %v523_v42 }
 0x34c   : > { %v1278_v3 = vpop.f32.mrf.mxu1 }
 0x34d   : > { %v765_v4 = vadd.f32 %v1278_v3, %v690_v61 }
 0x34e   : > { %v759_v5 = vpop.f32.mrf.mxu1 }
 0x34f   : > { %v777_v6 = vadd.f32 %v774_v2, %v765_v4  ;;  %v760_v7 = vadd.f32 %v759_v5, %v685_v63 }
 0x351   : > { %v776_v8 = vadd.f32 %v774_v2, %v760_v7  ;;  %v779_v9 = vmul.f32 %v1603_v34, %v777_v6 }
 0x353   : > { %v778_v10 = vmul.f32 %v1605_v38, %v776_v8  ;;  %v781_v12 = vmax.f32 %v779_v9, 0.0 }
 0x354   : > { %v1308_v16 = vpop.f32.mrf.mxu1 }
 0x355   : > { %v780_v11 = vmax.f32 %v778_v10, 0.0  ;;  %v952_v20 = vadd.f32 %v1308_v16, %v869_v17 }
 0x356   : > { %v942_v19 = vpop.f32.mrf.mxu1 }
 0x357   : > { %1317 = vmatprep.mubr.msk.f32.mxu0 %vm536_vm2, %v780_v11  ;;  %v951_v22 = vadd.f32 %v942_v19, %v864_v18 }
 0x358   : > { %1318 = vmatmul.mubr.msk.f32.vlgmr.msra.gmra.mxu0 %vm536_vm2, %v781_v12 }
 0x418   : > { %v1319_v21 = vpop.f32.mrf.mxu0 }
 0x419   : > { %v1035_v23 = vadd.f32 %v1319_v21, %v952_v20 }
 0x41a   : > { %v1025_v24 = vpop.f32.mrf.mxu0 }
 0x41b   : > { %1037 = vst.msk [vmem:[%s313_s24 + $0x8] sm:$0xff] %vm347_vm0, %v1035_v23  ;;  %v1034_v25 = vadd.f32 %v1025_v24, %v951_v22 }
 0x41d   : > { %1036 = vst.msk [vmem:[%s313_s24] sm:$0xff] %vm347_vm0, %v1034_v25 }
 0x41e   : > { %1378 = shalt.err (!%p1375_p3)
}
 0x41f   : > { %s1379_s20 = scalar_lea.hbm %s1701_s13, 256  ;;  %s1383_s24 = scalar_lea.hbm %s1753_s8, 1024 }
 0x420   : > { %p1380_p4 = scmp.ne.s32.totalorder %s1701_s13, %s1379_s20  ;;  %p1384_p9 = scmp.lt.s32.totalorder %s1701_s13, %s1753_s8 }
 0x421   : > { %p1385_p10 = scmp.lt.s32.totalorder %s1383_s24, %s1379_s20 }
 0x422   : > { %p1381_p7 = pnand %p1380_p4, %p1513_p5 }
 0x423   : > { %p1386_p11 = por %p1385_p10, %p1384_p9 }
 0x424   : > { %p1382_p8 = pneg %p1381_p7 }
 0x426   : > { %p1387_p12 = pnand %p1386_p11, %p1382_p8 }
 0x428   : > { %1390 = shalt.err (!%p1387_p12)
}
 0x429   : > { %s1428_s26 = smov 128   ;;  %s1429_s17 = smov 8  }
 0x42a   : > { %1320 = dma.vmem_to_hbm [thread:$0]  (%p1513_p5), %s1696_s25, 256, %s1701_s13, %s1705_s9, %s1428_s26, %s1428_s26, %s1429_s17  }
 0x42b PF: > { %p1326_p13 = scmp.ge.s32.totalorder %s1425_s30, 2  ;;  %s1067_s18 = sand.u32 1, %s1413_s27  }
 0x42c   : > { %s1068_s19 = scalar_lea.sflag [#allocation3], %s1067_s18 }
 0x42d   : > { %p1323_p0 = pnand %p1326_p13, %p1517_p6 }
 0x42f   : > { %p1324_p1 = pneg %p1323_p0 }
 0x431   : > { %1408 = dma.done.wait (%p1324_p1), %s1068_s19, 256  }
 0x432   : > { %1410 = vsyncadd (%p1324_p1), %s1068_s19, 4294967040  ;;  %p18_p2 = scmp.ge.s32.totalorder %s1500_s11, 6   ;;  %s1756_s27 = smov %s1417_s28 }
 0x433   : > { %s1757_s28 = smov %s1421_s29  ;;  %s1758_s29 = smov %s1511_s14 }
 0x434   : > { %s1759_s30 = smov %s1500_s11  ;;  %20 = sbr.rel (!%p18_p2) target bundleno = 3 (0x3), region = 90 }
 0x439   :  { %1073 = vsyncpa [#allocation3], 1 }
 0x43a   :  { %1075 = vsyncpa [#allocation3 + $0x1], 1 }

</bundles_post_ra>
